<compile_context>
chip_gen: v5e
topology: v5e:2x2
jax: 0.10.0
libtpu: 0.0.40
codegen_flags: <defaults>
</compile_context>

<pallas_src>
import jax
import jax.numpy as jnp
import numpy as np
from jax.experimental import pallas as pl
from jax.experimental.pallas import tpu as pltpu

N_IN = 3        # real input features
H = 128         # padded hidden width (10 real units)
OUT_PAD = 16    # padded output width (10 real logits); do NOT widen to 128
MAX_BM = 4096   # max rows per grid step (multiple of 256); see VMEM note above


def _choose_tiling(B: int):
    """Pick (BM, B_pad, grid) adaptively.

    tiny B  -> a single step of round_up(B, 8) rows (no wasted compute);
    large B -> tiles of up to MAX_BM rows with >= 2 (preferably even) steps so
               both v7x TensorCores get balanced work.
    """
    rup = lambda x, m: ((x + m - 1) // m) * m
    if B <= 256:
        bm = rup(max(B, 1), 8)
        return bm, bm, 1
    steps = max(2, (B + MAX_BM - 1) // MAX_BM)   # >= 2 steps: both v7x TCs busy
    if steps % 2:                                # prefer an even, balanced count
        steps += 1
    align = 256 if B >= 512 else 8
    bm = rup((B + steps - 1) // steps, align)
    b_pad = rup(B, bm)
    return bm, b_pad, b_pad // bm


def fixer_kernel(x_ref, w_ref, b_ref, out_ref):
    # x_ref: (BM, 3) raw features (preprocessing already folded into layer 1).
    # w_ref: (128, 512) packed [W1 | W2 | W3 | W4] (zero-padded).
    # b_ref: (1, 512)   packed [b1 | b2 | b3 | b4] (zero-padded).
    x = x_ref[...]

    # Layer 1 (3 -> 128-padded) as three VPU rank-1 FMAs: keeps the tiny K=3
    # contraction off the MXU entirely.
    h = (x[:, 0:1] * w_ref[0:1, 0:H]
         + x[:, 1:2] * w_ref[1:2, 0:H]
         + x[:, 2:3] * w_ref[2:3, 0:H]
         + b_ref[:, 0:H])
    h = jnp.maximum(h, 0.0)

    # Layers 2 and 3 (128-padded -> 128-padded) on the MXU, f32 accumulation.
    h = jnp.dot(h, w_ref[:, H:2 * H], preferred_element_type=jnp.float32) + b_ref[:, H:2 * H]
    h = jnp.maximum(h, 0.0)
    h = jnp.dot(h, w_ref[:, 2 * H:3 * H], preferred_element_type=jnp.float32) + b_ref[:, 2 * H:3 * H]
    h = jnp.maximum(h, 0.0)

    # Output layer (128-padded -> 16-lane slab; 10 real logits, rest zero).
    out_ref[...] = (jnp.dot(h, w_ref[:, 3 * H:3 * H + OUT_PAD],
                            preferred_element_type=jnp.float32)
                    + b_ref[:, 3 * H:3 * H + OUT_PAD])


def init_fixer_params(key, n_in=3, layers=(10, 10, 10), n_out=10):
    """Deterministic PyTorch-Linear-style init (U[-1/sqrt(fan_in), 1/sqrt(fan_in)]).

    Weights stored as (in, out) so the forward computes x @ W + b.
    """
    dims = [n_in] + list(layers) + [n_out]
    params = []
    for i in range(len(dims) - 1):
        fan_in, fan_out = dims[i], dims[i + 1]
        key, kw, kb = jax.random.split(key, 3)
        bound = 1.0 / np.sqrt(fan_in)
        w = jax.random.uniform(kw, (fan_in, fan_out), jnp.float32, -bound, bound)
        b = jax.random.uniform(kb, (fan_out,), jnp.float32, -bound, bound)
        params.append((w, b))
    return params


def prepare_fixer_params(params):
    """One-time, per-parameter-set prep (hoisted out of the per-call path).

    Folds the hstack shift/scale into layer 1 and packs all weights/biases into
    a single (128, 512) / (1, 512) f32 slab pair.  Zero padding keeps padded
    hidden lanes exactly zero through ReLU.
    """
    (w1, b1), (w2, b2), (w3, b3), (w4, b4) = params
    shift = jnp.array([0.0, 0.0, -100000.0], jnp.float32)
    scale = jnp.array([1.0, 1.0e-3, 1.0 / 200000.0], jnp.float32)
    w1f = scale[:, None] * w1.astype(jnp.float32)                 # (3, 10)
    b1f = (shift * scale) @ w1.astype(jnp.float32) + b1.astype(jnp.float32)

    w_slab = jnp.zeros((H, 4 * H), jnp.float32)
    b_slab = jnp.zeros((1, 4 * H), jnp.float32)
    for k, (w, b) in enumerate([(w1f, b1f), (w2, b2), (w3, b3), (w4, b4)]):
        w = w.astype(jnp.float32)
        b = b.astype(jnp.float32)
        w_slab = w_slab.at[: w.shape[0], k * H: k * H + w.shape[1]].set(w)
        b_slab = b_slab.at[0, k * H: k * H + b.shape[0]].set(b)
    return w_slab, b_slab


@jax.jit
def fixer_forward_pallas(bsw, gor, q_gl_max, w_slab, b_slab):
    B = bsw.shape[0]
    bm, b_pad, grid = _choose_tiling(B)

    # Raw stacked features (B, 3); the hstack scaling lives in the weight slab.
    x = jnp.stack([bsw, gor, q_gl_max], axis=1).astype(jnp.float32)
    if b_pad != B:
        x = jnp.pad(x, ((0, b_pad - B), (0, 0)))

    cost = pl.CostEstimate(
        flops=2 * b_pad * (N_IN * H + 2 * H * H + H * OUT_PAD),
        transcendentals=0,
        bytes_accessed=4 * (b_pad * (N_IN + OUT_PAD) + H * 4 * H + 4 * H),
    )

    out_pad = pl.pallas_call(
        fixer_kernel,
        out_shape=jax.ShapeDtypeStruct((b_pad, OUT_PAD), jnp.float32),
        grid=(grid,),
        in_specs=[
            pl.BlockSpec((bm, N_IN), lambda i: (i, 0)),
            # Grid-invariant slabs: constant block index keeps them resident.
            pl.BlockSpec((H, 4 * H), lambda i: (0, 0)),
            pl.BlockSpec((1, 4 * H), lambda i: (0, 0)),
        ],
        out_specs=pl.BlockSpec((bm, OUT_PAD), lambda i: (i, 0)),
        compiler_params=pltpu.CompilerParams(dimension_semantics=("parallel",)),
        cost_estimate=cost,
    )(x, w_slab, b_slab)

    # NOTE: padded rows B..B_pad contain bias-propagated values; never consume
    # out_pad beyond [:B, :10].
    return out_pad[:B, :10].reshape(B, 2, 5)


def fixer_forward_ref(bsw, gor, q_gl_max, params):
    x = jnp.stack([bsw, gor / 1000.0, (q_gl_max - 100000.0) / 200000.0], axis=1)
    h = x.astype(jnp.float32)
    for i, (w, b) in enumerate(params):
        h = h @ w + b
        if i < len(params) - 1:
            h = jnp.maximum(h, 0.0)
    return h.reshape(h.shape[0], 2, 5)


if __name__ == "__main__":
    key = jax.random.PRNGKey(0)
    k_params, k_bsw, k_gor, k_q = jax.random.split(key, 4)

    params = init_fixer_params(k_params)
    w_slab, b_slab = prepare_fixer_params(params)   # one-time prep (hoisted)

    # Small shapes consistent with the module's forward.
    B = 8
    bsw = jax.random.uniform(k_bsw, (B,), jnp.float32, 0.0, 1.0)
    gor = jax.random.uniform(k_gor, (B,), jnp.float32, 0.0, 2000.0)
    q_gl_max = jax.random.uniform(k_q, (B,), jnp.float32, 0.0, 300000.0)

    out = fixer_forward_pallas(bsw, gor, q_gl_max, w_slab, b_slab)
    jax.block_until_ready(out)
    assert out.shape == (B, 2, 5), out.shape
    ref = fixer_forward_ref(bsw, gor, q_gl_max, params)
    np.testing.assert_allclose(np.asarray(out), np.asarray(ref), rtol=1e-5, atol=1e-5)

    # Also exercise the multi-step path (grid=2, padded batch rows).
    B2 = 700
    k2a, k2b, k2c = jax.random.split(jax.random.PRNGKey(1), 3)
    bsw2 = jax.random.uniform(k2a, (B2,), jnp.float32, 0.0, 1.0)
    gor2 = jax.random.uniform(k2b, (B2,), jnp.float32, 0.0, 2000.0)
    q2 = jax.random.uniform(k2c, (B2,), jnp.float32, 0.0, 300000.0)
    out2 = fixer_forward_pallas(bsw2, gor2, q2, w_slab, b_slab)
    jax.block_until_ready(out2)
    ref2 = fixer_forward_ref(bsw2, gor2, q2, params)
    np.testing.assert_allclose(np.asarray(out2), np.asarray(ref2), rtol=1e-5, atol=1e-5)

    print("KERNEL_OK")
</pallas_src>

<mosaic_0001>
module attributes {stable_mosaic.version = 11 : i64} {
  func.func @fixer_kernel(%arg0: i32, %arg1: memref<8x3xf32, #tpu.memory_space<vmem>>, %arg2: memref<128x512xf32, #tpu.memory_space<vmem>>, %arg3: memref<1x512xf32, #tpu.memory_space<vmem>>, %arg4: memref<8x16xf32, #tpu.memory_space<vmem>>) attributes {dimension_semantics = [#tpu.dimension_semantics<parallel>], iteration_bounds = array<i64: 1>, scalar_prefetch = 0 : i64, scratch_operands = 0 : i64, tpu.core_type = #tpu.core_type<tc>, window_params = [{transform_indices = @transform_0, window_bounds = array<i64: 8, 3>}, {pipeline_mode = #tpu.pipeline_mode<synchronous>, transform_indices = @transform_1, window_bounds = array<i64: 128, 512>}, {pipeline_mode = #tpu.pipeline_mode<synchronous>, transform_indices = @transform_2, window_bounds = array<i64: 1, 512>}, {transform_indices = @transform_3, window_bounds = array<i64: 8, 16>}]} {
    %c0 = arith.constant 0 : index
    %c0_0 = arith.constant 0 : index
    %0 = vector.load %arg1[%c0, %c0_0] : memref<8x3xf32, #tpu.memory_space<vmem>>, vector<8x3xf32>
    %1 = vector.extract_strided_slice %0 {offsets = [0, 0], sizes = [8, 1], strides = [1, 1]} : vector<8x3xf32> to vector<8x1xf32>
    %c0_1 = arith.constant 0 : index
    %c0_2 = arith.constant 0 : index
    %2 = vector.load %arg2[%c0_1, %c0_2] : memref<128x512xf32, #tpu.memory_space<vmem>>, vector<1x128xf32>
    %3 = vector.broadcast %1 : vector<8x1xf32> to vector<8x128xf32>
    %4 = vector.broadcast %2 : vector<1x128xf32> to vector<8x128xf32>
    %5 = arith.mulf %3, %4 : vector<8x128xf32>
    %6 = vector.extract_strided_slice %0 {offsets = [0, 1], sizes = [8, 1], strides = [1, 1]} : vector<8x3xf32> to vector<8x1xf32>
    %c1 = arith.constant 1 : index
    %c0_3 = arith.constant 0 : index
    %7 = vector.load %arg2[%c1, %c0_3] : memref<128x512xf32, #tpu.memory_space<vmem>>, vector<1x128xf32>
    %8 = vector.broadcast %6 : vector<8x1xf32> to vector<8x128xf32>
    %9 = vector.broadcast %7 : vector<1x128xf32> to vector<8x128xf32>
    %10 = arith.mulf %8, %9 : vector<8x128xf32>
    %11 = arith.addf %5, %10 : vector<8x128xf32>
    %12 = vector.extract_strided_slice %0 {offsets = [0, 2], sizes = [8, 1], strides = [1, 1]} : vector<8x3xf32> to vector<8x1xf32>
    %c2 = arith.constant 2 : index
    %c0_4 = arith.constant 0 : index
    %13 = vector.load %arg2[%c2, %c0_4] : memref<128x512xf32, #tpu.memory_space<vmem>>, vector<1x128xf32>
    %14 = vector.broadcast %12 : vector<8x1xf32> to vector<8x128xf32>
    %15 = vector.broadcast %13 : vector<1x128xf32> to vector<8x128xf32>
    %16 = arith.mulf %14, %15 : vector<8x128xf32>
    %17 = arith.addf %11, %16 : vector<8x128xf32>
    %c0_5 = arith.constant 0 : index
    %c0_6 = arith.constant 0 : index
    %18 = vector.load %arg3[%c0_5, %c0_6] : memref<1x512xf32, #tpu.memory_space<vmem>>, vector<1x128xf32>
    %19 = vector.broadcast %18 : vector<1x128xf32> to vector<8x128xf32>
    %20 = arith.addf %17, %19 : vector<8x128xf32>
    %cst = arith.constant 0.000000e+00 : f32
    %21 = vector.broadcast %cst : f32 to vector<8x128xf32>
    %22 = arith.maximumf %20, %21 : vector<8x128xf32>
    %c0_7 = arith.constant 0 : index
    %c128 = arith.constant 128 : index
    %23 = vector.load %arg2[%c0_7, %c128] : memref<128x512xf32, #tpu.memory_space<vmem>>, vector<128x128xf32>
    %cst_8 = arith.constant dense<0.000000e+00> : vector<8x128xf32>
    %24 = tpu.matmul %22, %23, %cst_8 {dimension_numbers = #tpu.dot_dimension_numbers<[1], [0], [0], [1], [0, 0, 1, 1], [], []>} : vector<8x128xf32>, vector<128x128xf32>, vector<8x128xf32> -> vector<8x128xf32>
    %c0_9 = arith.constant 0 : index
    %c128_10 = arith.constant 128 : index
    %25 = vector.load %arg3[%c0_9, %c128_10] : memref<1x512xf32, #tpu.memory_space<vmem>>, vector<1x128xf32>
    %26 = vector.broadcast %25 : vector<1x128xf32> to vector<8x128xf32>
    %27 = arith.addf %24, %26 : vector<8x128xf32>
    %cst_11 = arith.constant 0.000000e+00 : f32
    %28 = vector.broadcast %cst_11 : f32 to vector<8x128xf32>
    %29 = arith.maximumf %27, %28 : vector<8x128xf32>
    %c0_12 = arith.constant 0 : index
    %c256 = arith.constant 256 : index
    %30 = vector.load %arg2[%c0_12, %c256] : memref<128x512xf32, #tpu.memory_space<vmem>>, vector<128x128xf32>
    %cst_13 = arith.constant dense<0.000000e+00> : vector<8x128xf32>
    %31 = tpu.matmul %29, %30, %cst_13 {dimension_numbers = #tpu.dot_dimension_numbers<[1], [0], [0], [1], [0, 0, 1, 1], [], []>} : vector<8x128xf32>, vector<128x128xf32>, vector<8x128xf32> -> vector<8x128xf32>
    %c0_14 = arith.constant 0 : index
    %c256_15 = arith.constant 256 : index
    %32 = vector.load %arg3[%c0_14, %c256_15] : memref<1x512xf32, #tpu.memory_space<vmem>>, vector<1x128xf32>
    %33 = vector.broadcast %32 : vector<1x128xf32> to vector<8x128xf32>
    %34 = arith.addf %31, %33 : vector<8x128xf32>
    %cst_16 = arith.constant 0.000000e+00 : f32
    %35 = vector.broadcast %cst_16 : f32 to vector<8x128xf32>
    %36 = arith.maximumf %34, %35 : vector<8x128xf32>
    %c0_17 = arith.constant 0 : index
    %c384 = arith.constant 384 : index
    %37 = vector.load %arg2[%c0_17, %c384] : memref<128x512xf32, #tpu.memory_space<vmem>>, vector<128x16xf32>
    %cst_18 = arith.constant dense<0.000000e+00> : vector<8x16xf32>
    %38 = tpu.matmul %36, %37, %cst_18 {dimension_numbers = #tpu.dot_dimension_numbers<[1], [0], [0], [1], [0, 0, 1, 1], [], []>} : vector<8x128xf32>, vector<128x16xf32>, vector<8x16xf32> -> vector<8x16xf32>
    %c0_19 = arith.constant 0 : index
    %c384_20 = arith.constant 384 : index
    %39 = vector.load %arg3[%c0_19, %c384_20] : memref<1x512xf32, #tpu.memory_space<vmem>>, vector<1x16xf32>
    %40 = vector.broadcast %39 : vector<1x16xf32> to vector<8x16xf32>
    %41 = arith.addf %38, %40 : vector<8x16xf32>
    %c0_21 = arith.constant 0 : index
    %c0_22 = arith.constant 0 : index
    %42 = vector.load %arg4[%c0_21, %c0_22] : memref<8x16xf32, #tpu.memory_space<vmem>>, vector<8x16xf32>
    tpu.vector_store %arg4[%c0_21, %c0_22], %41 {strides = array<i32>} : memref<8x16xf32, #tpu.memory_space<vmem>>, vector<8x16xf32>,
    return
  }
  func.func @transform_0(%arg0: i32) -> (i32, i32) {
    %c0_i32 = arith.constant 0 : i32
    %c0_i32_0 = arith.constant 0 : i32
    return %arg0, %c0_i32 : i32, i32
  }
  func.func @transform_1(%arg0: i32) -> (i32, i32) {
    %c0_i32 = arith.constant 0 : i32
    %c0_i32_0 = arith.constant 0 : i32
    %c0_i32_1 = arith.constant 0 : i32
    return %c0_i32, %c0_i32_0 : i32, i32
  }
  func.func @transform_2(%arg0: i32) -> (i32, i32) {
    %c0_i32 = arith.constant 0 : i32
    %c0_i32_0 = arith.constant 0 : i32
    %c0_i32_1 = arith.constant 0 : i32
    return %c0_i32, %c0_i32_0 : i32, i32
  }
  func.func @transform_3(%arg0: i32) -> (i32, i32) {
    %c0_i32 = arith.constant 0 : i32
    %c0_i32_0 = arith.constant 0 : i32
    return %arg0, %c0_i32 : i32, i32
  }
}

</mosaic_0001>

<bundles_post_ra>
// kernel: fixer_forward_pallas.1
= control target key start
LH: loop header
LB: loop body
LE: loop exit
PB: predicated region body
PF: predicated region fallthrough
CT: control target
= control target key end

     0   :  { %8 = vsyncpa [#allocation3], 0  ;;  %s227_s15 = smov [#allocation2]   ;;  %s228_s17 = smov 512   ;;  %s274_s0 = inlined_call_operand.vmem [shape: f32[8,3], index: 0, kind: input, shape index: {}]   ;;  %s275_s1 = inlined_call_operand.hbm [shape: f32[128,512], index: 1, kind: input, shape index: {}]   ;;  %s276_s2 = inlined_call_operand.vmem [shape: f32[1,512], index: 2, kind: input, shape index: {}]   ;;  %s277_s3 = inlined_call_operand.vmem [shape: f32[8,16], index: 3, kind: output, shape index: {}]  }
   0x1   :  { %s15_s14 = sshll.u32 %s275_s1, 4  ;;  %s17_s16 = sshll.u32 %s227_s15, 4  ;;  %s16_s14 = int_to_ptr.hbm [resolvable:$true] %s15_s14  ;;  %s18_s16 = int_to_ptr.vmem [resolvable:$true] %s17_s16 }
   0x2   :  { %s229_s18 = smov 32  }
   0x3   :  { %23 = dma.hbm_to_vmem [thread:$0]  %s16_s14, 8192, %s18_s16, [#allocation3], %s228_s17, %s228_s17, %s229_s18  }
   0x4   :  { %225 = dma.done.wait [#allocation3], 8192  }
   0x5   :  { %226 = vsyncadd [#allocation3], 4294959104  ;;  %v230_v0 = vmov 0   ;;  %v231_v1 = vmov 2   ;;  %v30_v2 = vld [vmem:[%s274_s0] sm:$0xff]  ;;  %v73_v3 = vld [vmem:[#allocation2 + $0x1e8] sm:$0xff] }
   0x6   :  { %193 = vset.pattern.permute.xlu0 %v230_v0  ;;  %195 = vset.pattern.permute.xlu1 %v231_v1  ;;  %v72_v4 = vld [vmem:[#allocation2 + $0x1c8] sm:$0xff]  ;;  %v232_v8 = vmov 1   ;;  %v114_v20 = vld [vmem:[#allocation2 + $0x1f0] sm:$0xff]  ;;  %v31_v32 = vld [vmem:[#allocation2] ss:$0 sm:$0xff]  ;;  %vm180_vm0 = vcmask 130048  }
   0x7   :  { %34 = vperm.xlu0 %193, %v30_v2   ;;  %47 = vperm.xlu1 %195, %v30_v2   ;;  %v71_v5 = vld [vmem:[#allocation2 + $0x1a8] sm:$0xff]  ;;  %v113_v21 = vld [vmem:[#allocation2 + $0x1d0] sm:$0xff]  ;;  %v38_v33 = vld [vmem:[#allocation2 + $0x1] ss:$0 sm:$0xff] }
   0x8   :  { %78 = vmatpush.msra.mxu0 %v73_v3  ;;  %v70_v6 = vld [vmem:[#allocation2 + $0x188] sm:$0xff]  ;;  %119 = vmatpush.msra.mxu1 %v114_v20  ;;  %v112_v22 = vld [vmem:[#allocation2 + $0x1b0] sm:$0xff]  ;;  %v45_v34 = vld [vmem:[#allocation2 + $0x2] ss:$0 sm:$0xff] }
   0x9   :  { %v69_v7 = vld [vmem:[#allocation2 + $0x168] sm:$0xff]  ;;  %v111_v23 = vld [vmem:[#allocation2 + $0x190] sm:$0xff]  ;;  %v197_v43 = vld [vmem:[%s276_s2] ss:$0 sm:$0xff] }
   0xa   :  { %79 = vmatpush.msra.mxu0 %v72_v4  ;;  %v68_v9 = vld [vmem:[#allocation2 + $0x148] sm:$0xff]  ;;  %120 = vmatpush.msra.mxu1 %v113_v21  ;;  %v110_v24 = vld [vmem:[#allocation2 + $0x170] sm:$0xff]  ;;  %v155_v50 = vld [vmem:[#allocation2 + $0x1f8] sm:$0xff] }
   0xb   :  { %v67_v10 = vld [vmem:[#allocation2 + $0x128] sm:$0xff]  ;;  %v109_v25 = vld [vmem:[#allocation2 + $0x150] sm:$0xff]  ;;  %v154_v51 = vld [vmem:[#allocation2 + $0x1d8] sm:$0xff]  ;;  %160 = vmatpush.msra.mxu2 %v155_v50 }
   0xc   :  { %80 = vmatpush.msra.mxu0 %v71_v5  ;;  %v66_v11 = vld [vmem:[#allocation2 + $0x108] sm:$0xff]  ;;  %121 = vmatpush.msra.mxu1 %v112_v22  ;;  %v108_v26 = vld [vmem:[#allocation2 + $0x130] sm:$0xff]  ;;  %v153_v52 = vld [vmem:[#allocation2 + $0x1b8] sm:$0xff] }
   0xd   :  { %v65_v12 = vld [vmem:[#allocation2 + $0xe8] sm:$0xff]  ;;  %v107_v28 = vld [vmem:[#allocation2 + $0x110] sm:$0xff]  ;;  %161 = vmatpush.msra.mxu2 %v154_v51  ;;  %v152_v53 = vld [vmem:[#allocation2 + $0x198] sm:$0xff] }
   0xe   :  { %81 = vmatpush.msra.mxu0 %v70_v6  ;;  %v64_v13 = vld [vmem:[#allocation2 + $0xc8] sm:$0xff]  ;;  %122 = vmatpush.msra.mxu1 %v111_v23  ;;  %v106_v29 = vld [vmem:[#allocation2 + $0xf0] sm:$0xff]  ;;  %v151_v54 = vld [vmem:[#allocation2 + $0x178] sm:$0xff] }
   0xf   :  { %194 = vset.pattern.permute.xlu0 %v232_v8  ;;  %v63_v14 = vld [vmem:[#allocation2 + $0xa8] sm:$0xff]  ;;  %v105_v30 = vld [vmem:[#allocation2 + $0xd0] sm:$0xff]  ;;  %162 = vmatpush.msra.mxu2 %v153_v52  ;;  %v150_v55 = vld [vmem:[#allocation2 + $0x158] sm:$0xff] }
  0x10   :  { %40 = vperm.xlu0 %194, %v30_v2   ;;  %82 = vmatpush.msra.mxu0 %v69_v7  ;;  %v62_v15 = vld [vmem:[#allocation2 + $0x88] sm:$0xff]  ;;  %v104_v31 = vld [vmem:[#allocation2 + $0xb0] sm:$0xff]  ;;  %v149_v56 = vld [vmem:[#allocation2 + $0x138] sm:$0xff] }
  0x11   :  { %v61_v16 = vld [vmem:[#allocation2 + $0x68] sm:$0xff]  ;;  %123 = vmatpush.msra.mxu1 %v110_v24  ;;  %v103_v36 = vld [vmem:[#allocation2 + $0x90] sm:$0xff]  ;;  %163 = vmatpush.msra.mxu2 %v152_v53  ;;  %v148_v57 = vld [vmem:[#allocation2 + $0x118] sm:$0xff] }
  0x12   :  { %83 = vmatpush.msra.mxu0 %v68_v9  ;;  %v60_v17 = vld [vmem:[#allocation2 + $0x48] sm:$0xff]  ;;  %v102_v41 = vld [vmem:[#allocation2 + $0x70] sm:$0xff]  ;;  %v147_v58 = vld [vmem:[#allocation2 + $0xf8] sm:$0xff] }
  0x13   :  { %v59_v18 = vld [vmem:[#allocation2 + $0x28] sm:$0xff]  ;;  %124 = vmatpush.msra.mxu1 %v109_v25  ;;  %v101_v47 = vld [vmem:[#allocation2 + $0x50] sm:$0xff]  ;;  %164 = vmatpush.msra.mxu2 %v151_v54  ;;  %v146_v59 = vld [vmem:[#allocation2 + $0xd8] sm:$0xff] }
  0x14   :  { %84 = vmatpush.msra.mxu0 %v67_v10  ;;  %v58_v19 = vld [vmem:[#allocation2 + $0x8] sm:$0xff]  ;;  %v100_v48 = vld [vmem:[#allocation2 + $0x30] sm:$0xff]  ;;  %v145_v60 = vld [vmem:[#allocation2 + $0xb8] sm:$0xff] }
  0x15   :  { %125 = vmatpush.msra.mxu1 %v108_v26  ;;  %v99_v49 = vld [vmem:[#allocation2 + $0x10] sm:$0xff]  ;;  %165 = vmatpush.msra.mxu2 %v150_v55  ;;  %v144_v61 = vld [vmem:[#allocation2 + $0x98] sm:$0xff]  ;;  %v198_v63 = vld [vmem:[%s276_s2 + $0x1] ss:$0 sm:$0xff] }
  0x16   :  { %85 = vmatpush.msra.mxu0 %v66_v11  ;;  %v143_v62 = vld [vmem:[#allocation2 + $0x78] sm:$0xff]  ;;  %v199_v6 = vld [vmem:[%s276_s2 + $0x2] ss:$0 sm:$0xff]  ;;  %v200_v10 = vld [vmem:[%s276_s2 + $0x3] ss:$0 sm:$0xff] }
  0x17   :  { %126 = vmatpush.msra.mxu1 %v107_v28  ;;  %166 = vmatpush.msra.mxu2 %v149_v56  ;;  %v142_v3 = vld [vmem:[#allocation2 + $0x58] sm:$0xff] }
  0x18   :  { %196 = vset.pattern.permute.xlu0 %v231_v1  ;;  %86 = vmatpush.msra.mxu0 %v65_v12  ;;  %v141_v4 = vld [vmem:[#allocation2 + $0x38] sm:$0xff] }
  0x19   :  { %127 = vmatpush.msra.mxu1 %v106_v29  ;;  %167 = vmatpush.msra.mxu2 %v148_v57  ;;  %v140_v5 = vld [vmem:[#allocation2 + $0x18] sm:$0xff] }
  0x1a   :  { %87 = vmatpush.msra.mxu0 %v64_v13 }
  0x1b   :  { %128 = vmatpush.msra.mxu1 %v105_v30  ;;  %168 = vmatpush.msra.mxu2 %v147_v58 }
  0x1c   :  { %88 = vmatpush.msra.mxu0 %v63_v14 }
  0x1d   :  { %129 = vmatpush.msra.mxu1 %v104_v31  ;;  %169 = vmatpush.msra.mxu2 %v146_v59 }
  0x1e   :  { %89 = vmatpush.msra.mxu0 %v62_v15 }
  0x1f   :  { %130 = vmatpush.msra.mxu1 %v103_v36  ;;  %170 = vmatpush.msra.mxu2 %v145_v60 }
  0x20   :  { %90 = vmatpush.msra.mxu0 %v61_v16 }
  0x21   :  { %131 = vmatpush.msra.mxu1 %v102_v41  ;;  %171 = vmatpush.msra.mxu2 %v144_v61 }
  0x22   :  { %91 = vmatpush.msra.mxu0 %v60_v17 }
  0x23   :  { %132 = vmatpush.msra.mxu1 %v101_v47  ;;  %172 = vmatpush.msra.mxu2 %v143_v62 }
  0x24   :  { %92 = vmatpush.msra.mxu0 %v59_v18 }
  0x25   :  { %133 = vmatpush.msra.mxu1 %v100_v48  ;;  %173 = vmatpush.msra.mxu2 %v142_v3 }
  0x26   :  { %93 = vmatpush.msra.mxu0 %v58_v19 }
  0x27   :  { %134 = vmatpush.msra.mxu1 %v99_v49  ;;  %174 = vmatpush.msra.mxu2 %v141_v4 }
  0x29   :  { %175 = vmatpush.msra.mxu2 %v140_v5 }
  0x79   :  { %v35_v27 = vpop.permute.xlu0 %34  ;;  %v48_v35 = vpop.permute.xlu1 %47 }
  0x7a   :  { %v37_v38 = vmul.f32 %v35_v27, %v31_v32  ;;  %v50_v40 = vmul.f32 %v48_v35, %v45_v34 }
  0x82   :  { %v41_v37 = vpop.permute.xlu0 %40 }
  0x83   :  { %v43_v39 = vmul.f32 %v41_v37, %v38_v33 }
  0x85   :  { %v44_v42 = vadd.f32 %v43_v39, %v37_v38 }
  0x87   :  { %v51_v44 = vadd.f32 %v50_v40, %v44_v42 }
  0x89   :  { %v56_v45 = vadd.f32 %v197_v43, %v51_v44 }
  0x8b   :  { %v57_v46 = vmax.f32 %v56_v45, 0.0 }
  0x8d   :  { %94 = vmatmul.f32.vlgmr.msra.gmra.mxu0 %v57_v46 }
 0x10a   :  { %v95_v0 = vpop.f32.mrf.mxu0 }
 0x10b   :  { %v96_v1 = vadd.f32 %v198_v63, %v95_v0 }
 0x10d   :  { %v98_v2 = vmax.f32 %v96_v1, 0.0 }
 0x10f   :  { %135 = vmatmul.f32.vlgmr.msra.gmra.mxu1 %v98_v2 }
 0x18c   :  { %v136_v7 = vpop.f32.mrf.mxu1 }
 0x18d   :  { %v137_v8 = vadd.f32 %v199_v6, %v136_v7 }
 0x18f   :  { %v139_v9 = vmax.f32 %v137_v8, 0.0 }
 0x191   :  { %176 = vmatmul.f32.vlgmr.msra.gmra.mxu2 %v139_v9 }
 0x214   :  { %v177_v11 = vpop.f32.mrf.mxu2 }
 0x215   :  { %v178_v12 = vadd.f32 %v200_v10, %v177_v11 }
 0x217   :  { %181 = vst.msk [vmem:[%s277_s3] sm:$0xff] %vm180_vm0, %v178_v12 }
 0x218   :  { %186 = vsyncpa [#allocation3], 1 }

</bundles_post_ra>
